<compile_context>
chip_gen: v6e
topology: v6e:2x2x1
jax: 0.10.0
libtpu: 0.0.40
codegen_flags: <defaults>
</compile_context>

<pallas_src>
import functools
import math

import jax
import jax.numpy as jnp
from jax import lax
from jax.experimental import pallas as pl
from jax.experimental.pallas import tpu as pltpu

_LANES = 128

# Abramowitz & Stegun 4.4.46: acos(x) = sqrt(1-x) * P7(x) for 0 <= x <= 1,
# |error| <= 2e-8 rad; acos(-x) = pi - acos(x).  (Horner order: a7 .. a0)
_ACOS_COEFFS = (
    -0.0012624911,
    0.0066700901,
    -0.0170881256,
    0.0308918810,
    -0.0501743046,
    0.0889789874,
    -0.2145988016,
    1.5707963050,
)


def _acos(x):
    """Elementwise arccos for x in [-1, 1] using only sqrt/mul/add/where."""
    ax = jnp.abs(x)
    p = jnp.full_like(ax, _ACOS_COEFFS[0])
    for c in _ACOS_COEFFS[1:]:
        p = p * ax + c
    pos = jnp.sqrt(1.0 - ax) * p
    return jnp.where(x >= 0, pos, jnp.float32(math.pi) - pos)


def _angle_from_sums(dot, yy, gg):
    """acos(dot / (sqrt(yy)*sqrt(gg) + 1e-5)) with EUP-friendly reciprocal."""
    # Two sqrts (EUP slot is otherwise idle) match the reference's norm
    # product without the overflow/underflow risk of sqrt(yy*gg).
    denom = jnp.sqrt(yy) * jnp.sqrt(gg) + 1e-5
    r = pl.reciprocal(denom, approx=True)
    r = r * (2.0 - denom * r)           # one Newton step: keeps |cos| accurate
    # clip: reference yields NaN if rounding pushes |cos| slightly over 1.
    cos = jnp.clip(dot * r, -1.0, 1.0)
    return _acos(cos)


# --------------------------------------------------------------------------
# Pixel-major kernel (N % 128 == 0): blocks of (1, C, tile_rows, 128).
# --------------------------------------------------------------------------
def _sam_rows_kernel(y_ref, gt_ref, out_ref, *, channels, tile_rows, row_chunk,
                     n_rows, needs_mask):
    n_chunks = tile_rows // row_chunk

    def chunk_partial(r0):
        zero = jnp.zeros((row_chunk, _LANES), jnp.float32)
        dot, yy, gg = zero, zero, zero
        sl = pl.ds(r0, row_chunk)
        # C is static -> plain Python loop; one pass over y/g, accumulators
        # stay in vregs.  TODO(synk): for very large C (>>100) switch to a
        # rolled lax.fori_loop to bound code size.
        for c in range(channels):
            yc = y_ref[0, c, sl, :].astype(jnp.float32)
            gc = gt_ref[0, c, sl, :].astype(jnp.float32)
            dot = dot + yc * gc
            yy = yy + yc * yc
            gg = gg + gc * gc
        ang = _angle_from_sums(dot, yy, gg)          # (row_chunk, 128)
        if needs_mask:
            # N % 128 == 0 here, so only whole *rows* (grid padding in the
            # last tile) can be invalid: a per-row compare is enough, and the
            # whole block is skipped at trace time when the grid divides.
            row0 = pl.program_id(1) * tile_rows + r0
            rows = row0 + lax.broadcasted_iota(jnp.int32, (row_chunk, _LANES), 0)
            ang = jnp.where(rows < n_rows, ang, 0.0)  # select: NaN-safe
        return jnp.sum(ang, axis=0, keepdims=True)    # (1, 128)

    if n_chunks == 1:
        total = chunk_partial(0)
    else:
        def body(i, acc):
            r0 = pl.multiple_of(i * row_chunk, row_chunk)
            return acc + chunk_partial(r0)
        total = lax.fori_loop(0, n_chunks, body,
                              jnp.zeros((1, _LANES), jnp.float32))
    out_ref[...] = total.reshape(1, 1, 1, _LANES)


# --------------------------------------------------------------------------
# Ragged-N kernel (N % 128 != 0): blocks of (1, C, tile_n) on raw (B, C, N).
# --------------------------------------------------------------------------
def _sam_flat_kernel(y_ref, gt_ref, out_ref, *, n_pixels, tile_n, needs_mask):
    y = y_ref[...].astype(jnp.float32)               # (1, C, tile_n)
    g = gt_ref[...].astype(jnp.float32)
    dot = jnp.sum(y * g, axis=1)                     # (1, tile_n)
    yy = jnp.sum(y * y, axis=1)
    gg = jnp.sum(g * g, axis=1)
    ang = _angle_from_sums(dot, yy, gg)
    if needs_mask:
        pix = (pl.program_id(1) * tile_n
               + lax.broadcasted_iota(jnp.int32, ang.shape, 1))
        ang = jnp.where(pix < n_pixels, ang, 0.0)     # select, not multiply
    s = jnp.sum(ang)
    # Spread the scalar evenly over 128 lanes (exact: /128 is a power of two)
    # so the partial-sum output stays lane-dense.
    out_ref[...] = jnp.zeros((1, 1, 1, _LANES), jnp.float32) + s * (1.0 / _LANES)


# --------------------------------------------------------------------------
# Wrapper
# --------------------------------------------------------------------------
@functools.lru_cache(maxsize=None)
def _default_vmem_limit():
    cap = 64 * 1024 * 1024                 # conservative fallback (= v7x physical)
    try:
        cap = int(pltpu.get_tpu_info().vmem_capacity_bytes)
    except Exception:
        pass
    # Half of physical VMEM: 64 MiB on v5e/v6e (128 MiB), 32 MiB on v7x (64 MiB).
    return min(64 * 1024 * 1024, max(16 * 1024 * 1024, cap // 2))


def _pick_row_chunk(tile_rows):
    for rc in (32, 16, 8):
        if tile_rows % rc == 0:
            return rc
    return tile_rows


def _sam_aligned(y, gt, vmem_limit_bytes):
    B, C, H, W = y.shape
    N = H * W
    n_rows = N // _LANES
    yf = y.reshape(B, C, n_rows, _LANES)   # free: N % 128 == 0 (no pad/copy)
    gf = gt.reshape(B, C, n_rows, _LANES)

    itemsize = jnp.dtype(y.dtype).itemsize
    # 2 inputs x 2 pipeline buffers (input dtype) dominate VMEM; in-kernel f32
    # intermediates are bounded by the small row_chunk, not the tile.
    budget = (vmem_limit_bytes * 3) // 5
    rows_fit = budget // (2 * 2 * C * _LANES * itemsize)
    tile_rows = max(8, min(1024, (rows_fit // 32) * 32))
    if B == 1 and n_rows > 8:
        # v7x megacore: keep >= 2 blocks on the 'parallel' pixel axis.
        half = -(-n_rows // 2)
        tile_rows = min(tile_rows, ((half + 7) // 8) * 8)
    if tile_rows >= n_rows:
        tile_rows = n_rows
    elif n_rows % tile_rows:
        # Prefer a divisor of n_rows (within 2x) so the mask drops at trace time.
        for cand in range(tile_rows, max(8, tile_rows // 2) - 1, -8):
            if n_rows % cand == 0:
                tile_rows = cand
                break
    num_tiles = -(-n_rows // tile_rows)
    needs_mask = (num_tiles * tile_rows) != n_rows
    row_chunk = _pick_row_chunk(tile_rows)

    kernel = functools.partial(
        _sam_rows_kernel, channels=C, tile_rows=tile_rows, row_chunk=row_chunk,
        n_rows=n_rows, needs_mask=needs_mask)
    # NOTE: for tiny tiles (large C) pipeline_mode=pl.Buffered(3) would hide
    # DMA issue latency; we prefer larger tiles instead for portability.
    return pl.pallas_call(
        kernel,
        out_shape=jax.ShapeDtypeStruct((B, num_tiles, 1, _LANES), jnp.float32),
        grid=(B, num_tiles),
        in_specs=[
            pl.BlockSpec((1, C, tile_rows, _LANES), lambda b, t: (b, 0, t, 0)),
            pl.BlockSpec((1, C, tile_rows, _LANES), lambda b, t: (b, 0, t, 0)),
        ],
        out_specs=pl.BlockSpec((1, 1, 1, _LANES), lambda b, t: (b, t, 0, 0)),
        compiler_params=pltpu.CompilerParams(
            dimension_semantics=("parallel", "parallel"),
            vmem_limit_bytes=int(vmem_limit_bytes),
        ),
    )(yf, gf)


def _sam_flat(y, gt, vmem_limit_bytes):
    B, C, H, W = y.shape
    N = H * W
    yf = y.reshape(B, C, N)                # free collapse of H, W
    gf = gt.reshape(B, C, N)

    itemsize = jnp.dtype(y.dtype).itemsize
    budget = (vmem_limit_bytes * 2) // 5   # whole-tile f32 intermediates live here
    fit = budget // (2 * 2 * C * itemsize)
    tile_n = max(_LANES, min(4096, (fit // _LANES) * _LANES))
    if N >= _LANES:
        tile_n = min(tile_n, (N // _LANES) * _LANES)
    else:
        tile_n = N                          # full-extent block, no masking
    num_tiles = -(-N // tile_n)
    needs_mask = (num_tiles * tile_n) != N

    kernel = functools.partial(_sam_flat_kernel, n_pixels=N, tile_n=tile_n,
                               needs_mask=needs_mask)
    return pl.pallas_call(
        kernel,
        out_shape=jax.ShapeDtypeStruct((B, num_tiles, 1, _LANES), jnp.float32),
        grid=(B, num_tiles),
        in_specs=[
            pl.BlockSpec((1, C, tile_n), lambda b, t: (b, 0, t)),
            pl.BlockSpec((1, C, tile_n), lambda b, t: (b, 0, t)),
        ],
        out_specs=pl.BlockSpec((1, 1, 1, _LANES), lambda b, t: (b, t, 0, 0)),
        compiler_params=pltpu.CompilerParams(
            dimension_semantics=("parallel", "parallel"),
            vmem_limit_bytes=int(vmem_limit_bytes),
        ),
    )(yf, gf)


def sam_loss(y, gt, *, vmem_limit_bytes=None):
    """Pallas implementation of SAMLoss.forward for NCHW inputs."""
    B, C, H, W = y.shape
    if vmem_limit_bytes is None:
        vmem_limit_bytes = _default_vmem_limit()
    if (H * W) % _LANES == 0:
        partials = _sam_aligned(y, gt, vmem_limit_bytes)
    else:
        # TODO(synk): in the ragged path the channel axis sits on sublanes, so
        # the per-pixel epilogue runs on 1/8-dense vregs; acceptable here since
        # this path avoids the old jnp.pad HBM copy and stays HBM-bound.
        partials = _sam_flat(y, gt, vmem_limit_bytes)
    return jnp.sum(partials) / (B * H * W) * 180.0 / 3.14159


def sam_loss_ref(y, gt):
    """Pure-JAX reference mirroring the PyTorch module."""
    B, C, H, W = y.shape
    yf = y.reshape(B, C, -1).astype(jnp.float32)
    gf = gt.reshape(B, C, -1).astype(jnp.float32)
    yn = jnp.sqrt(jnp.sum(yf * yf, axis=1))
    gn = jnp.sqrt(jnp.sum(gf * gf, axis=1))
    num = jnp.sum(yf * gf, axis=1)
    sam = num / (yn * gn + 1e-5)
    return jnp.sum(jnp.arccos(sam)) / (B * H * W) * 180.0 / 3.14159


if __name__ == "__main__":
    key = jax.random.PRNGKey(0)

    configs = [
        ((2, 4, 16, 16), jnp.float32),    # aligned path, single row-chunk
        ((1, 6, 16, 16), jnp.bfloat16),   # bf16 ingest, B == 1
        ((2, 3, 15, 13), jnp.float32),    # ragged N -> flat kernel + tail mask
        ((2, 4, 96, 96), jnp.float32),    # aligned path, chunked channel pass
    ]
    for shape, dtype in configs:
        key, k1, k2 = jax.random.split(key, 3)
        yv = jax.random.normal(k1, shape, dtype=jnp.float32).astype(dtype)
        gv = jax.random.normal(k2, shape, dtype=jnp.float32).astype(dtype)
        out = jax.block_until_ready(sam_loss(yv, gv))
        ref = sam_loss_ref(yv, gv)
        assert jnp.allclose(out, ref, rtol=1e-4, atol=1e-3), (shape, dtype, out, ref)
    print("KERNEL_OK")
</pallas_src>

<mosaic_0001>
module attributes {stable_mosaic.version = 11 : i64} {
  func.func @_sam_rows_kernel(%arg0: i32, %arg1: i32, %arg2: memref<1x4x2x128xf32, #tpu.memory_space<vmem>>, %arg3: memref<1x4x2x128xf32, #tpu.memory_space<vmem>>, %arg4: memref<1x1x1x128xf32, #tpu.memory_space<vmem>>) attributes {dimension_semantics = [#tpu.dimension_semantics<parallel>, #tpu.dimension_semantics<parallel>], iteration_bounds = array<i64: 2, 1>, scalar_prefetch = 0 : i64, scratch_operands = 0 : i64, tpu.core_type = #tpu.core_type<tc>, window_params = [{transform_indices = @transform_0, window_bounds = array<i64: 1, 4, 2, 128>}, {transform_indices = @transform_1, window_bounds = array<i64: 1, 4, 2, 128>}, {transform_indices = @transform_2, window_bounds = array<i64: 1, 1, 1, 128>}]} {
    %cst = arith.constant 0.000000e+00 : f32
    %0 = vector.broadcast %cst : f32 to vector<2x128xf32>
    %c0 = arith.constant 0 : index
    %c0_0 = arith.constant 0 : index
    %c0_1 = arith.constant 0 : index
    %c0_2 = arith.constant 0 : index
    %1 = vector.load %arg2[%c0, %c0_0, %c0_1, %c0_2] : memref<1x4x2x128xf32, #tpu.memory_space<vmem>>, vector<1x1x2x128xf32>
    %2 = vector.shape_cast %1 : vector<1x1x2x128xf32> to vector<2x128xf32>
    %c0_3 = arith.constant 0 : index
    %c0_4 = arith.constant 0 : index
    %c0_5 = arith.constant 0 : index
    %c0_6 = arith.constant 0 : index
    %3 = vector.load %arg3[%c0_3, %c0_4, %c0_5, %c0_6] : memref<1x4x2x128xf32, #tpu.memory_space<vmem>>, vector<1x1x2x128xf32>
    %4 = vector.shape_cast %3 : vector<1x1x2x128xf32> to vector<2x128xf32>
    %5 = arith.mulf %2, %4 : vector<2x128xf32>
    %6 = arith.addf %0, %5 : vector<2x128xf32>
    %7 = arith.mulf %2, %2 : vector<2x128xf32>
    %8 = arith.addf %0, %7 : vector<2x128xf32>
    %9 = arith.mulf %4, %4 : vector<2x128xf32>
    %10 = arith.addf %0, %9 : vector<2x128xf32>
    %c0_7 = arith.constant 0 : index
    %c1 = arith.constant 1 : index
    %c0_8 = arith.constant 0 : index
    %c0_9 = arith.constant 0 : index
    %11 = vector.load %arg2[%c0_7, %c1, %c0_8, %c0_9] : memref<1x4x2x128xf32, #tpu.memory_space<vmem>>, vector<1x1x2x128xf32>
    %12 = vector.shape_cast %11 : vector<1x1x2x128xf32> to vector<2x128xf32>
    %c0_10 = arith.constant 0 : index
    %c1_11 = arith.constant 1 : index
    %c0_12 = arith.constant 0 : index
    %c0_13 = arith.constant 0 : index
    %13 = vector.load %arg3[%c0_10, %c1_11, %c0_12, %c0_13] : memref<1x4x2x128xf32, #tpu.memory_space<vmem>>, vector<1x1x2x128xf32>
    %14 = vector.shape_cast %13 : vector<1x1x2x128xf32> to vector<2x128xf32>
    %15 = arith.mulf %12, %14 : vector<2x128xf32>
    %16 = arith.addf %6, %15 : vector<2x128xf32>
    %17 = arith.mulf %12, %12 : vector<2x128xf32>
    %18 = arith.addf %8, %17 : vector<2x128xf32>
    %19 = arith.mulf %14, %14 : vector<2x128xf32>
    %20 = arith.addf %10, %19 : vector<2x128xf32>
    %c0_14 = arith.constant 0 : index
    %c2 = arith.constant 2 : index
    %c0_15 = arith.constant 0 : index
    %c0_16 = arith.constant 0 : index
    %21 = vector.load %arg2[%c0_14, %c2, %c0_15, %c0_16] : memref<1x4x2x128xf32, #tpu.memory_space<vmem>>, vector<1x1x2x128xf32>
    %22 = vector.shape_cast %21 : vector<1x1x2x128xf32> to vector<2x128xf32>
    %c0_17 = arith.constant 0 : index
    %c2_18 = arith.constant 2 : index
    %c0_19 = arith.constant 0 : index
    %c0_20 = arith.constant 0 : index
    %23 = vector.load %arg3[%c0_17, %c2_18, %c0_19, %c0_20] : memref<1x4x2x128xf32, #tpu.memory_space<vmem>>, vector<1x1x2x128xf32>
    %24 = vector.shape_cast %23 : vector<1x1x2x128xf32> to vector<2x128xf32>
    %25 = arith.mulf %22, %24 : vector<2x128xf32>
    %26 = arith.addf %16, %25 : vector<2x128xf32>
    %27 = arith.mulf %22, %22 : vector<2x128xf32>
    %28 = arith.addf %18, %27 : vector<2x128xf32>
    %29 = arith.mulf %24, %24 : vector<2x128xf32>
    %30 = arith.addf %20, %29 : vector<2x128xf32>
    %c0_21 = arith.constant 0 : index
    %c3 = arith.constant 3 : index
    %c0_22 = arith.constant 0 : index
    %c0_23 = arith.constant 0 : index
    %31 = vector.load %arg2[%c0_21, %c3, %c0_22, %c0_23] : memref<1x4x2x128xf32, #tpu.memory_space<vmem>>, vector<1x1x2x128xf32>
    %32 = vector.shape_cast %31 : vector<1x1x2x128xf32> to vector<2x128xf32>
    %c0_24 = arith.constant 0 : index
    %c3_25 = arith.constant 3 : index
    %c0_26 = arith.constant 0 : index
    %c0_27 = arith.constant 0 : index
    %33 = vector.load %arg3[%c0_24, %c3_25, %c0_26, %c0_27] : memref<1x4x2x128xf32, #tpu.memory_space<vmem>>, vector<1x1x2x128xf32>
    %34 = vector.shape_cast %33 : vector<1x1x2x128xf32> to vector<2x128xf32>
    %35 = arith.mulf %32, %34 : vector<2x128xf32>
    %36 = arith.addf %26, %35 : vector<2x128xf32>
    %37 = arith.mulf %32, %32 : vector<2x128xf32>
    %38 = arith.addf %28, %37 : vector<2x128xf32>
    %39 = arith.mulf %34, %34 : vector<2x128xf32>
    %40 = arith.addf %30, %39 : vector<2x128xf32>
    %41 = math.sqrt %38 : vector<2x128xf32>
    %42 = math.sqrt %40 : vector<2x128xf32>
    %43 = arith.mulf %41, %42 : vector<2x128xf32>
    %cst_28 = arith.constant 9.99999974E-6 : f32
    %44 = vector.broadcast %cst_28 : f32 to vector<2x128xf32>
    %45 = arith.addf %43, %44 : vector<2x128xf32>
    %46 = tpu.reciprocal %45 {approx = true} : vector<2x128xf32> -> vector<2x128xf32>
    %47 = arith.mulf %45, %46 : vector<2x128xf32>
    %cst_29 = arith.constant 2.000000e+00 : f32
    %48 = vector.broadcast %cst_29 : f32 to vector<2x128xf32>
    %49 = arith.subf %48, %47 : vector<2x128xf32>
    %50 = arith.mulf %46, %49 : vector<2x128xf32>
    %51 = arith.mulf %36, %50 : vector<2x128xf32>
    %cst_30 = arith.constant -1.000000e+00 : f32
    %cst_31 = arith.constant 1.000000e+00 : f32
    %52 = vector.broadcast %cst_30 : f32 to vector<2x128xf32>
    %53 = arith.maximumf %52, %51 : vector<2x128xf32>
    %54 = vector.broadcast %cst_31 : f32 to vector<2x128xf32>
    %55 = arith.minimumf %54, %53 : vector<2x128xf32>
    %56 = math.absf %55 : vector<2x128xf32>
    %cst_32 = arith.constant -0.0012624911 : f32
    %57 = vector.broadcast %cst_32 : f32 to vector<2x128xf32>
    %58 = arith.mulf %57, %56 : vector<2x128xf32>
    %cst_33 = arith.constant 6.670090e-03 : f32
    %59 = vector.broadcast %cst_33 : f32 to vector<2x128xf32>
    %60 = arith.addf %58, %59 : vector<2x128xf32>
    %61 = arith.mulf %60, %56 : vector<2x128xf32>
    %cst_34 = arith.constant -0.0170881264 : f32
    %62 = vector.broadcast %cst_34 : f32 to vector<2x128xf32>
    %63 = arith.addf %61, %62 : vector<2x128xf32>
    %64 = arith.mulf %63, %56 : vector<2x128xf32>
    %cst_35 = arith.constant 0.0308918804 : f32
    %65 = vector.broadcast %cst_35 : f32 to vector<2x128xf32>
    %66 = arith.addf %64, %65 : vector<2x128xf32>
    %67 = arith.mulf %66, %56 : vector<2x128xf32>
    %cst_36 = arith.constant -0.0501743034 : f32
    %68 = vector.broadcast %cst_36 : f32 to vector<2x128xf32>
    %69 = arith.addf %67, %68 : vector<2x128xf32>
    %70 = arith.mulf %69, %56 : vector<2x128xf32>
    %cst_37 = arith.constant 0.0889789909 : f32
    %71 = vector.broadcast %cst_37 : f32 to vector<2x128xf32>
    %72 = arith.addf %70, %71 : vector<2x128xf32>
    %73 = arith.mulf %72, %56 : vector<2x128xf32>
    %cst_38 = arith.constant -0.214598805 : f32
    %74 = vector.broadcast %cst_38 : f32 to vector<2x128xf32>
    %75 = arith.addf %73, %74 : vector<2x128xf32>
    %76 = arith.mulf %75, %56 : vector<2x128xf32>
    %cst_39 = arith.constant 1.57079625 : f32
    %77 = vector.broadcast %cst_39 : f32 to vector<2x128xf32>
    %78 = arith.addf %76, %77 : vector<2x128xf32>
    %cst_40 = arith.constant 1.000000e+00 : f32
    %79 = vector.broadcast %cst_40 : f32 to vector<2x128xf32>
    %80 = arith.subf %79, %56 : vector<2x128xf32>
    %81 = math.sqrt %80 : vector<2x128xf32>
    %82 = arith.mulf %81, %78 : vector<2x128xf32>
    %cst_41 = arith.constant 0.000000e+00 : f32
    %83 = vector.broadcast %cst_41 : f32 to vector<2x128xf32>
    %84 = arith.cmpf oge, %55, %83 : vector<2x128xf32>
    %cst_42 = arith.constant 3.14159274 : f32
    %85 = vector.broadcast %cst_42 : f32 to vector<2x128xf32>
    %86 = arith.subf %85, %82 : vector<2x128xf32>
    %87 = arith.select %84, %82, %86 : vector<2x128xi1>, vector<2x128xf32>
    %cst_43 = arith.constant dense<0.000000e+00> : vector<128xf32>
    %88 = vector.multi_reduction <add>, %87, %cst_43 [0] : vector<2x128xf32> to vector<128xf32>
    %89 = vector.shape_cast %88 : vector<128xf32> to vector<1x128xf32>
    %90 = vector.shape_cast %89 : vector<1x128xf32> to vector<1x1x1x128xf32>
    %c0_44 = arith.constant 0 : index
    %c0_45 = arith.constant 0 : index
    %c0_46 = arith.constant 0 : index
    %c0_47 = arith.constant 0 : index
    %91 = vector.load %arg4[%c0_44, %c0_45, %c0_46, %c0_47] : memref<1x1x1x128xf32, #tpu.memory_space<vmem>>, vector<1x1x1x128xf32>
    tpu.vector_store %arg4[%c0_44, %c0_45, %c0_46, %c0_47], %90 {strides = array<i32>} : memref<1x1x1x128xf32, #tpu.memory_space<vmem>>, vector<1x1x1x128xf32>,
    return
  }
  func.func @transform_0(%arg0: i32, %arg1: i32) -> (i32, i32, i32, i32) {
    %c0_i32 = arith.constant 0 : i32
    %c0_i32_0 = arith.constant 0 : i32
    %c0_i32_1 = arith.constant 0 : i32
    return %arg0, %c0_i32, %arg1, %c0_i32_0 : i32, i32, i32, i32
  }
  func.func @transform_1(%arg0: i32, %arg1: i32) -> (i32, i32, i32, i32) {
    %c0_i32 = arith.constant 0 : i32
    %c0_i32_0 = arith.constant 0 : i32
    %c0_i32_1 = arith.constant 0 : i32
    return %arg0, %c0_i32, %arg1, %c0_i32_0 : i32, i32, i32, i32
  }
  func.func @transform_2(%arg0: i32, %arg1: i32) -> (i32, i32, i32, i32) {
    %c0_i32 = arith.constant 0 : i32
    %c0_i32_0 = arith.constant 0 : i32
    %c0_i32_1 = arith.constant 0 : i32
    return %arg0, %arg1, %c0_i32, %c0_i32_0 : i32, i32, i32, i32
  }
}

</mosaic_0001>

<bundles_post_ra>
// kernel: tpu_custom_call.1
= control target key start
LH: loop header
LB: loop body
LE: loop exit
PB: predicated region body
PF: predicated region fallthrough
CT: control target
= control target key end

     0   :  { %7 = vsyncpa [#allocation3], 0  ;;  %s866_s0 = inlined_call_operand.hbm [shape: f32[2,4,2,128], index: 0, kind: input, shape index: {}]   ;;  %s867_s1 = inlined_call_operand.hbm [shape: f32[2,4,2,128], index: 1, kind: input, shape index: {}]   ;;  %s868_s2 = inlined_call_operand.hbm [shape: f32[2,1,1,128], index: 2, kind: output, shape index: {}]  }
   0x1   :  { %9 = vsyncpa [#allocation3 + $0x1], 0 }
   0x2   :  { %10 = vsyncpa [#allocation6], 0 }
   0x3   :  { %12 = vsyncpa [#allocation6 + $0x1], 0 }
   0x4   :  { %13 = vsyncpa [#allocation4], 0 }
   0x5   :  { %15 = vsyncpa [#allocation4 + $0x1], 0  ;;  %s698_s9 = smov 0   ;;  %s700_s10 = smov 0  }
   0x6   :  { %s702_s11 = smov 0   ;;  %s704_s12 = smov 0  }
   0x7   :  { %s706_s13 = smov 0   ;;  %s708_s14 = smov 0  }
   0x8 LB: > { %s434_s15 = sadd.s32 4294967295, %s676_s14   ;;  %s435_s16 = sadd.s32 4294967294, %s676_s14   ;;  %s676_s14 = sphi %s708_s14, %s21_s14   ;;  %s672_s13 = sphi %s706_s13, %s880_s13   ;;  %s668_s12 = sphi %s704_s12, %s879_s12   ;;  %s664_s11 = sphi %s702_s11, %s878_s11   ;;  %s660_s10 = sphi %s700_s10, %s877_s10   ;;  %s656_s9 = sphi %s698_s9, %s876_s9  }
   0x9   : > { %s33_s17 = sadd.s32 1, %s672_s13  ;;  %s42_s18 = sadd.s32 1, %s664_s11 }
   0xa   : > { %p35_p0 = scmp.ge.s32.totalorder %s33_s17, 2  ;;  %p49_p1 = scmp.ne.s32.totalorder %s664_s11, %s660_s10 }
   0xb   : > { %p50_p2 = scmp.eq.s32.totalorder %s676_s14, 0  ;;  %p55_p3 = scmp.ne.s32.totalorder %s660_s10, %s656_s9 }
   0xc   : > { %s882_s17 = smov (%p35_p0, %s33_s17), 0  ;;  %p56_p5 = scmp.eq.s32.totalorder %s434_s15, 0 }
   0xd   : > { %p739_p4 = por %p50_p2, %p49_p1  ;;  %s37_s20 = ssub.s32 %s672_s13, %s882_s17 }
   0xe   : > { %p109_p6 = scmp.eq.s32.totalorder %s434_s15, 1  ;;  %p40_p7 = scmp.eq.s32.totalorder %s37_s20, 0 }
   0xf   : > { %p745_p8 = por %p56_p5, %p55_p3  ;;  %p115_p10 = scmp.eq.s32.totalorder %s435_s16, 1 }
  0x10   : > { %p749_p9 = por %p109_p6, %p49_p1  ;;  %p476_p13 = scmp.lt.s32.totalorder %s676_s14, 2 }
  0x11   : > { %s754_s23 = scalar_select %p40_p7, %s664_s11, %s42_s18  }
  0x12   : > { %p756_p11 = por %p115_p10, %p55_p3  ;;  %s763_s25 = sand.u32 1, %s664_s11  }
  0x13   : > { %s438_s26 = sshll.u32 %s763_s25, 3  ;;  %s457_s27 = sshll.u32 %s672_s13, 7 }
  0x14   : > { %s146_s30 = scalar_lea.hbm %s866_s0, %s457_s27  ;;  %s139_s3 = scalar_lea.vmem [#allocation2], %s438_s26 }
  0x15   : > { %s147_s4 = sshll.u32 %s139_s3, 4  ;;  %p776_p0 = pnand %p476_p13, %p739_p4  ;;  %s148_s4 = int_to_ptr.vmem [resolvable:$true] %s147_s4 }
  0x16   : > { %p444_p1 = scmp.ge.s32.totalorder %s676_s14, 1  ;;  %s136_s6 = scalar_lea.sflag [#allocation3], %s763_s25 }
  0x17   : > { %p538_p2 = pneg %p776_p0  ;;  %s549_s7 = scalar_lea.vmem %s148_s4, 128 }
  0x18   : > { %p550_p3 = scmp.ne.s32.totalorder %s148_s4, %s549_s7  ;;  %s678_s8 = smov [#allocation2]  }
  0x19   : > { %s554_s15 = sshll.u32 %s678_s8, 4  ;;  %s555_s15 = int_to_ptr.vmem [resolvable:$false] %s554_s15 }
  0x1a   : > { %p552_p5 = pnand %p550_p3, %p538_p2  ;;  %s556_s16 = scalar_lea.vmem %s555_s15, 256 }
  0x1b   : > { %p557_p4 = scmp.lt.s32.totalorder %s148_s4, %s555_s15  ;;  %p558_p7 = scmp.lt.s32.totalorder %s556_s16, %s549_s7 }
  0x1c   : > { %p553_p6 = pneg %p552_p5 }
  0x1d   : > { %p559_p10 = por %p558_p7, %p557_p4 }
  0x1f   : > { %p560_p13 = pnand %p559_p10, %p553_p6 }
  0x21   : > { %563 = shalt.err (!%p560_p13)
}
  0x22   : > { %s679_s18 = smov 32   ;;  %s680_s19 = smov 2  }
  0x23   : > { %468 = dma.hbm_to_vmem [thread:$0]  (!%p776_p0), %s146_s30, 128, %s148_s4, %s136_s6, %s679_s18, %s679_s18, %s680_s19  }
  0x24   : > { %p177_p3 = scmp.lt.s32.totalorder %s676_s14, 3  ;;  %s168_s29 = scalar_lea.hbm %s867_s1, %s457_s27 }
  0x25   : > { %s161_s7 = scalar_lea.vmem [#allocation5], %s438_s26  ;;  %s158_s15 = scalar_lea.sflag [#allocation6], %s763_s25 }
  0x26   : > { %p797_p5 = pnand %p444_p1, %p177_p3  ;;  %s169_s8 = sshll.u32 %s161_s7, 4  ;;  %s170_s8 = int_to_ptr.vmem [resolvable:$true] %s169_s8 }
  0x27   : > { %s577_s16 = scalar_lea.vmem %s170_s8, 128  ;;  %s681_s30 = smov [#allocation5]  }
  0x28   : > { %p578_p6 = scmp.ne.s32.totalorder %s170_s8, %s577_s16  ;;  %s582_s4 = sshll.u32 %s681_s30, 4  ;;  %s583_s4 = int_to_ptr.vmem [resolvable:$false] %s582_s4 }
  0x29   : > { %s584_s27 = scalar_lea.vmem %s583_s4, 256  ;;  %p585_p10 = scmp.lt.s32.totalorder %s170_s8, %s583_s4 }
  0x2a   : > { %p580_p4 = pnand %p578_p6, %p538_p2  ;;  %p586_p1 = scmp.lt.s32.totalorder %s584_s27, %s577_s16 }
  0x2c   : > { %p581_p7 = pneg %p580_p4  ;;  %p587_p13 = por %p586_p1, %p585_p10 }
  0x2e   : > { %p588_p3 = pnand %p587_p13, %p581_p7 }
  0x30   : > { %591 = shalt.err (!%p588_p3)
}
  0x31   : > { %471 = dma.hbm_to_vmem [thread:$0]  (!%p776_p0), %s168_s29, 128, %s170_s8, %s158_s15, %s679_s18, %s679_s18, %s680_s19  }
  0x32   : > { %181 = sbr.rel (%p797_p5) target bundleno = 176 (0xb0), region = 28  ;;  %s812_s25 = sand.u32 (!%p797_p5), 1, %s660_s10  }
  0x33   : > { %s445_s26 = sshll.u32 (!%p797_p5), %s812_s25, 3  ;;  %s184_s6 = scalar_lea.sflag (!%p797_p5), [#allocation3], %s812_s25 }
  0x34   : > { %s187_s20 = scalar_lea.vmem (!%p797_p5), [#allocation2], %s445_s26 }
  0x37   : > { %643 = dma.done.wait (%p745_p8), %s184_s6, 128  }
  0x38   : > { %645 = vsyncadd (%p745_p8), %s184_s6, 4294967168  ;;  %s193_s5 = scalar_lea.sflag [#allocation6], %s812_s25  ;;  %s196_s18 = scalar_lea.vmem [#allocation5], %s445_s26 }
  0x39   : > { %647 = dma.done.wait (%p745_p8), %s193_s5, 128  }
  0x3a   : > { %649 = vsyncadd (%p745_p8), %s193_s5, 4294967168  ;;  %v221_v0 = vld [vmem:[%s187_s20] sm:$0x3]  ;;  %v222_v1 = vld [vmem:[%s196_s18] sm:$0x3]  ;;  %vm309_vm7 = vcmask 1041408  }
  0x3b   : > { %v447_v2 = vld [vmem:[%s187_s20 + $0x2] sm:$0x3]  ;;  %v225_v3 = vmul.f32 %v221_v0, %v221_v0  ;;  %v227_v4 = vmul.f32 %v222_v1, %v222_v1  ;;  %v448_v5 = vld [vmem:[%s196_s18 + $0x2] sm:$0x3]  ;;  %v449_v7 = vld [vmem:[%s187_s20 + $0x4] sm:$0x3]  ;;  %v223_v34 = vmul.f32 %v222_v1, %v221_v0 }
  0x3c   : > { %v235_v6 = vmul.f32 %v447_v2, %v447_v2  ;;  %v450_v8 = vld [vmem:[%s196_s18 + $0x4] sm:$0x3]  ;;  %v237_v9 = vmul.f32 %v448_v5, %v448_v5  ;;  %v245_v10 = vmul.f32 %v449_v7, %v449_v7  ;;  %v451_v11 = vld [vmem:[%s187_s20 + $0x6] sm:$0x3]  ;;  %v452_v12 = vld [vmem:[%s196_s18 + $0x6] sm:$0x3]  ;;  %v233_v35 = vmul.f32 %v448_v5, %v447_v2 }
  0x3d   : > { %v247_v14 = vmul.f32 %v450_v8, %v450_v8  ;;  %v255_v15 = vmul.f32 %v451_v11, %v451_v11  ;;  %v257_v17 = vmul.f32 %v452_v12, %v452_v12  ;;  %v243_v37 = vmul.f32 %v450_v8, %v449_v7  ;;  %s220_s21 = scalar_lea.vmem [#allocation7], %s812_s25  ;;  %s454_s28 = sshll.u32 %s668_s12, 4 }
  0x3e   : > { %v236_v13 = vadd.f32 %v235_v6, %v225_v3  ;;  %v238_v16 = vadd.f32 %v237_v9, %v227_v4  ;;  %v234_v36 = vadd.f32 %v233_v35, %v223_v34  ;;  %v253_v39 = vmul.f32 %v452_v12, %v451_v11  ;;  %s332_s19 = sshll.u32 %s220_s21, 4  ;;  %s330_s7 = scalar_lea.hbm %s868_s2, %s454_s28  ;;  %s333_s19 = int_to_ptr.vmem [resolvable:$true] %s332_s19 }
  0x3f   : > { %s319_s8 = scalar_lea.sflag [#allocation4], %s812_s25  ;;  %s592_s15 = scalar_lea.vmem %s333_s19, 16 }
  0x40   : > { %v246_v18 = vadd.f32 %v245_v10, %v236_v13  ;;  %v248_v19 = vadd.f32 %v247_v14, %v238_v16  ;;  %v244_v38 = vadd.f32 %v243_v37, %v234_v36  ;;  %p593_p8 = scmp.ne.s32.totalorder %s333_s19, %s592_s15  ;;  %s682_s16 = smov [#allocation7]  }
  0x41   : > { %s596_s30 = sshll.u32 %s682_s16, 4  ;;  %s597_s30 = int_to_ptr.vmem [resolvable:$false] %s596_s30 }
  0x42   : > { %v256_v20 = vadd.f32 %v255_v15, %v246_v18  ;;  %v258_v21 = vadd.f32 %v257_v17, %v248_v19  ;;  %v254_v42 = vadd.f32 %v253_v39, %v244_v38  ;;  %p594_p0 = pnand %p593_p8, %p749_p9  ;;  %s598_s4 = scalar_lea.vmem %s597_s30, 32 }
  0x43   : > { %p599_p5 = scmp.lt.s32.totalorder %s333_s19, %s597_s30  ;;  %p600_p6 = scmp.lt.s32.totalorder %s598_s4, %s592_s15 }
  0x44   : > { %528 = vrsqrt.f32 %v256_v20  ;;  %vm261_vm0 = vcmp.eq.f32.partialorder %v256_v20, inf  ;;  %v264_v23 = vand.u32 2147483648, %v256_v20  ;;  %vm263_vm1 = vcmp.eq.f32.partialorder %v256_v20, 0.0  ;;  %p595_p2 = pneg %p594_p0 }
  0x45   : > { %530 = vrsqrt.f32 %v258_v21  ;;  %vm268_vm2 = vcmp.eq.f32.partialorder %v258_v21, inf  ;;  %v271_v26 = vand.u32 2147483648, %v258_v21  ;;  %vm270_vm3 = vcmp.eq.f32.partialorder %v258_v21, 0.0  ;;  %p601_p4 = por %p600_p6, %p599_p5 }
  0x47   : > { %p602_p7 = pnand %p601_p4, %p595_p2 }
  0x51   : > { %v529_v22 = vpop.eup %528 }
  0x52   : > { %v531_v24 = vpop.eup %530  ;;  %v260_v25 = vmul.f32 %v529_v22, %v256_v20 }
  0x53   : > { %v267_v27 = vmul.f32 %v531_v24, %v258_v21 }
  0x54   : > { %v262_v28 = vsel %vm261_vm0, %v256_v20, %v260_v25 }
  0x55   : > { %v265_v29 = vsel %vm263_vm1, %v264_v23, %v262_v28  ;;  %v269_v30 = vsel %vm268_vm2, %v258_v21, %v267_v27 }
  0x56   : > { %v272_v31 = vsel %vm270_vm3, %v271_v26, %v269_v30 }
  0x57   : > { %v273_v32 = vmul.f32 %v272_v31, %v265_v29 }
  0x59   : > { %v274_v33 = vadd.f32 1e-05, %v273_v32 }
  0x5b   : > { %532 = vrcp.f32 %v274_v33 }
  0x68   : > { %v533_v40 = vpop.eup %532 }
  0x69   : > { %v276_v41 = vmul.f32 %v533_v40, %v274_v33 }
  0x6b   : > { %v277_v43 = vsub.f32 2.0, %v276_v41 }
  0x6d   : > { %v278_v44 = vmul.f32 %v533_v40, %v277_v43 }
  0x6f   : > { %v279_v45 = vmul.f32 %v278_v44, %v254_v42 }
  0x71   : > { %v453_v46 = vclamps-f32 %v279_v45, 1.0 }
  0x73   : > { %v282_v47 = vand.u32 2147483647, %v453_v46  ;;  %vm306_vm6 = vcmp.ge.f32.partialorder %v453_v46, 0.0 }
  0x75   : > { %v283_v48 = vmul.f32 -0.0012624911, %v282_v47  ;;  %v297_v49 = vsub.f32 1.0, %v282_v47 }
  0x77   : > { %v284_v50 = vadd.f32 0.00667009, %v283_v48  ;;  %534 = vrsqrt.f32 %v297_v49  ;;  %vm300_vm4 = vcmp.eq.f32.partialorder %v297_v49, inf  ;;  %v303_v62 = vand.u32 2147483648, %v297_v49 }
  0x78   : > { %vm302_vm5 = vcmp.eq.f32.partialorder %v297_v49, 0.0 }
  0x79   : > { %v285_v51 = vmul.f32 %v284_v50, %v282_v47 }
  0x7b   : > { %v286_v52 = vadd.f32 -0.017088126, %v285_v51 }
  0x7d   : > { %v287_v53 = vmul.f32 %v286_v52, %v282_v47 }
  0x7f   : > { %v288_v54 = vadd.f32 0.03089188, %v287_v53 }
  0x81   : > { %v289_v55 = vmul.f32 %v288_v54, %v282_v47 }
  0x83   : > { %v290_v56 = vadd.f32 -0.050174303, %v289_v55 }
  0x84   : > { %v535_v57 = vpop.eup %534 }
  0x85   : > { %v291_v58 = vmul.f32 %v290_v56, %v282_v47  ;;  %v299_v60 = vmul.f32 %v535_v57, %v297_v49 }
  0x87   : > { %v292_v59 = vadd.f32 0.08897899, %v291_v58  ;;  %v301_v0 = vsel %vm300_vm4, %v297_v49, %v299_v60 }
  0x88   : > { %v304_v2 = vsel %vm302_vm5, %v303_v62, %v301_v0 }
  0x89   : > { %v293_v61 = vmul.f32 %v292_v59, %v282_v47 }
  0x8b   : > { %v294_v63 = vadd.f32 -0.2145988, %v293_v61 }
  0x8d   : > { %v295_v1 = vmul.f32 %v294_v63, %v282_v47 }
  0x8f   : > { %v296_v3 = vadd.f32 1.5707963, %v295_v1 }
  0x91   : > { %v305_v4 = vmul.f32 %v304_v2, %v296_v3 }
  0x93   : > { %v307_v5 = vsub.f32 3.1415927, %v305_v4 }
  0x95   : > { %v308_v6 = vsel %vm306_vm6, %v305_v4, %v307_v5 }
  0x96   : > { %v310_v7 = vsel %vm309_vm7, %v308_v6, 0.0 }
  0x97   : > { %v311_v8 = vrot.slane %v310_v7, 4 }
  0x99   : > { %v312_v9 = vadd.f32 %v311_v8, %v310_v7 }
  0x9b   : > { %v313_v10 = vrot.slane %v312_v9, 2 }
  0x9d   : > { %v314_v11 = vadd.f32 %v313_v10, %v312_v9 }
  0x9f   : > { %v315_v12 = vrot.slane %v314_v11, 1 }
  0xa1   : > { %v316_v13 = vadd.f32 %v315_v12, %v314_v11 }
  0xa3   : > { %317 = vst [vmem:[%s220_s21] sm:$0x1] %v316_v13 }
  0xa4   : > { %605 = shalt.err (!%p602_p7)
}
  0xa5   : > { %s606_s12 = scalar_lea.hbm %s330_s7, 16  ;;  %s610_s26 = scalar_lea.hbm %s868_s2, 32 }
  0xa6   : > { %p607_p10 = scmp.ne.s32.totalorder %s330_s7, %s606_s12  ;;  %p611_p3 = scmp.lt.s32.totalorder %s330_s7, %s868_s2 }
  0xa7   : > { %p612_p8 = scmp.lt.s32.totalorder %s610_s26, %s606_s12 }
  0xa8   : > { %p608_p1 = pnand %p607_p10, %p749_p9 }
  0xa9   : > { %p613_p0 = por %p612_p8, %p611_p3 }
  0xaa   : > { %p609_p13 = pneg %p608_p1 }
  0xac   : > { %p614_p12 = pnand %p613_p0, %p609_p13 }
  0xae   : > { %617 = shalt.err (!%p614_p12)
}
  0xaf   : > { %463 = dma.vmem_to_hbm [thread:$0]  (%p749_p9), %s333_s19, 16, %s330_s7, %s319_s8  }
  0xb0 PF: > { %s344_s5 = sand.u32 1, %s656_s9   ;;  %p875_p2 = scmp.ge.s32.totalorder %s676_s14, 2 }
  0xb1   : > { %s345_s18 = scalar_lea.sflag [#allocation4], %s344_s5 }
  0xb2   : > { %p473_p5 = pnand %p875_p2, %p756_p11 }
  0xb4   : > { %p474_p6 = pneg %p473_p5 }
  0xb6   : > { %651 = dma.done.wait (%p474_p6), %s345_s18, 16  }
  0xb7   : > { %653 = vsyncadd (%p474_p6), %s345_s18, 4294967280  ;;  %s21_s14 = sadd.s32 1, %s676_s14   ;;  %s876_s9 = smov %s660_s10 }
  0xb8   : > { %p18_p4 = scmp.ge.s32.totalorder %s21_s14, 4   ;;  %s877_s10 = smov %s664_s11 }
  0xb9   : > { %s878_s11 = smov %s754_s23  ;;  %s879_s12 = smov %s672_s13 }
  0xba   : > { %s880_s13 = smov %s882_s17  ;;  %20 = sbr.rel (!%p18_p4) target bundleno = 8 (0x8), region = 92 }
  0xbf   :  { %349 = vsyncpa [#allocation3], 1 }
  0xc0   :  { %351 = vsyncpa [#allocation3 + $0x1], 1 }
  0xc1   :  { %352 = vsyncpa [#allocation6], 1 }
  0xc2   :  { %354 = vsyncpa [#allocation6 + $0x1], 1 }
  0xc3   :  { %355 = vsyncpa [#allocation4], 1 }
  0xc4   :  { %357 = vsyncpa [#allocation4 + $0x1], 1 }

</bundles_post_ra>
